<compile_context>
chip_gen: v6e
topology: v6e:2x2x1
jax: 0.10.0
libtpu: 0.0.40
codegen_flags: <defaults>
</compile_context>

<pallas_src>
import jax
import jax.numpy as jnp
import numpy as np
from jax.experimental import pallas as pl
from jax.experimental.pallas import tpu as pltpu


def _round_up(x, m):
    return (x + m - 1) // m * m


def mlp_disc_kernel(x_ref, w1_ref, b1_ref, w2t_ref, b2t_ref, w3t_ref, b3_ref,
                    o_ref):
    """Fused fc1 -> ReLU -> fc2 -> ReLU -> fc3 -> Sigmoid on one row tile.

    x   : (TM, K)        w1 : (K, 128)    b1 : (1, 128)
    w2t : (64, 128)      b2t: (64, 1)     w3t: (1, 64)    b3: (1, 1)
    o   : (1, TM)        (lane-dense, transposed result row)
    """
    # Layer 1 in natural orientation: (TM, K) @ (K, 128) -> (TM, 128).
    h1 = jnp.dot(x_ref[...], w1_ref[...], preferred_element_type=jnp.float32)
    h1 = jnp.maximum(h1 + b1_ref[...], 0.0)

    # Switch to transposed orientation once (cheap XLU transpose, (8,128)-tiled
    # friendly since TM is a multiple of 128): (TM, 128) -> (128, TM).
    h1t = h1.T

    # Layer 2: (64, 128) @ (128, TM) -> (64, TM); bias is a (64,1) column
    # broadcast across lanes.
    h2t = jnp.dot(w2t_ref[...], h1t, preferred_element_type=jnp.float32)
    h2t = jnp.maximum(h2t + b2t_ref[...], 0.0)

    # Layer 3: (1, 64) @ (64, TM) -> (1, TM) logits row, then sigmoid.
    zt = jnp.dot(w3t_ref[...], h2t, preferred_element_type=jnp.float32)
    zt = zt + b3_ref[...]
    o_ref[...] = 1.0 / (1.0 + jnp.exp(-zt))


def trajectory_discriminator_forward(x, params, *, tm_max=1024):
    """Forward pass of TrajectoryDiscriminator.

    x      : (B, ...) -- flattened to (B, input_size) like x.view(B, -1)
    params : ((w1, b1), (w2, b2), (w3, b3)) with wi in (fan_in, fan_out) layout
    returns: (B, 1) sigmoid probabilities, float32
    """
    (w1, b1), (w2, b2), (w3, b3) = params
    b = x.shape[0]
    x2 = x.reshape(b, -1).astype(jnp.float32)
    k = x2.shape[1]
    h1 = w1.shape[1]
    h2 = w2.shape[1]

    # Batch tile: multiple of 128 rows (clean (8,128) layouts for the input
    # loads, the in-kernel transpose and the lane-dense output row).  Keep the
    # double-buffered input tile under ~6 MiB so we never hit the scoped-VMEM
    # default even for large feature counts.
    tm_max = max(128, _round_up(tm_max, 128))
    rows_for_vmem = max(128, ((6 * 1024 * 1024) // (2 * 4 * k)) // 128 * 128)
    tm = min(tm_max, rows_for_vmem, _round_up(b, 128))
    bp = _round_up(b, tm)
    if bp != b:
        x2 = jnp.pad(x2, ((0, bp - b), (0, 0)))
    grid = (bp // tm,)

    # Transposed small weights for the lane-dense (transposed) layers 2/3.
    # (Wrapper-side layout plumbing on <35 KiB of weights; done once per call.)
    w2t = w2.T                       # (h2, h1) = (64, 128)
    b2t = b2.reshape(h2, 1)          # (64, 1)
    w3t = w3.T                       # (1, 64)
    b3r = b3.reshape(1, 1)           # (1, 1)
    b1r = b1.reshape(1, h1)          # (1, 128)

    flops = 2 * bp * (k * h1 + h1 * h2 + h2 * 1)
    bytes_accessed = 4 * (bp * k + k * h1 + h1 + h1 * h2 + h2 + h2 + 1 + bp)

    out = pl.pallas_call(
        mlp_disc_kernel,
        out_shape=jax.ShapeDtypeStruct((1, bp), jnp.float32),
        grid_spec=pltpu.PrefetchScalarGridSpec(
            num_scalar_prefetch=0,
            grid=grid,
            in_specs=[
                pl.BlockSpec((tm, k), lambda i: (i, 0)),    # streamed row tile
                pl.BlockSpec((k, h1), lambda i: (0, 0)),    # weights: VMEM-resident
                pl.BlockSpec((1, h1), lambda i: (0, 0)),
                pl.BlockSpec((h2, h1), lambda i: (0, 0)),
                pl.BlockSpec((h2, 1), lambda i: (0, 0)),
                pl.BlockSpec((1, h2), lambda i: (0, 0)),
                pl.BlockSpec((1, 1), lambda i: (0, 0)),
            ],
            # Lane-dense output: one (1, TM) row per grid step.
            out_specs=pl.BlockSpec((1, tm), lambda i: (0, i)),
        ),
        compiler_params=pltpu.CompilerParams(
            dimension_semantics=("parallel",),
        ),
        cost_estimate=pl.CostEstimate(
            flops=flops, transcendentals=bp, bytes_accessed=bytes_accessed),
    )(x2, w1, b1r, w2t, b2t, w3t, b3r)

    return out[0, :b].reshape(b, 1)


# ---------------------------------------------------------------------------
# Pure-JAX reference (for correctness check only)
# ---------------------------------------------------------------------------
def _ref_forward(x, params):
    (w1, b1), (w2, b2), (w3, b3) = params
    h = x.reshape(x.shape[0], -1)
    h = jnp.maximum(h @ w1 + b1, 0.0)
    h = jnp.maximum(h @ w2 + b2, 0.0)
    z = h @ w3 + b3
    return jax.nn.sigmoid(z)


# ---------------------------------------------------------------------------
# Deterministic parameter init (mimics PyTorch nn.Linear defaults:
# uniform(-1/sqrt(fan_in), 1/sqrt(fan_in)) for both weight and bias).
# ---------------------------------------------------------------------------
def init_params(key, input_size=30):
    def linear(k, fan_in, fan_out):
        kw, kb = jax.random.split(k)
        bound = 1.0 / np.sqrt(fan_in)
        w = jax.random.uniform(kw, (fan_in, fan_out), jnp.float32,
                               minval=-bound, maxval=bound)
        bb = jax.random.uniform(kb, (fan_out,), jnp.float32,
                                minval=-bound, maxval=bound)
        return w, bb

    k1, k2, k3 = jax.random.split(key, 3)
    return (linear(k1, input_size, 128),
            linear(k2, 128, 64),
            linear(k3, 64, 1))


if __name__ == "__main__":
    key = jax.random.PRNGKey(0)
    kx, kp = jax.random.split(key)

    # Small shapes: batch=2, trajectory of 10 steps x 3 features -> flattens to 30.
    B, T, D = 2, 10, 3
    x = jax.random.normal(kx, (B, T, D), jnp.float32)
    params = init_params(kp, input_size=T * D)

    out = jax.block_until_ready(trajectory_discriminator_forward(x, params))
    ref = jax.block_until_ready(_ref_forward(x, params))

    assert out.shape == (B, 1), out.shape
    np.testing.assert_allclose(np.asarray(out), np.asarray(ref),
                               rtol=1e-3, atol=1e-3)
    print("KERNEL_OK")
</pallas_src>

<mosaic_0001>
module attributes {stable_mosaic.version = 11 : i64} {
  func.func @mlp_disc_kernel(%arg0: i32, %arg1: memref<128x30xf32, #tpu.memory_space<vmem>>, %arg2: memref<30x128xf32, #tpu.memory_space<vmem>>, %arg3: memref<1x128xf32, #tpu.memory_space<vmem>>, %arg4: memref<64x128xf32, #tpu.memory_space<vmem>>, %arg5: memref<64x1xf32, #tpu.memory_space<vmem>>, %arg6: memref<1x64xf32, #tpu.memory_space<vmem>>, %arg7: memref<1x1xf32, #tpu.memory_space<vmem>>, %arg8: memref<1x128xf32, #tpu.memory_space<vmem>>) attributes {dimension_semantics = [#tpu.dimension_semantics<parallel>], iteration_bounds = array<i64: 1>, scalar_prefetch = 0 : i64, scratch_operands = 0 : i64, tpu.core_type = #tpu.core_type<tc>, window_params = [{transform_indices = @transform_0, window_bounds = array<i64: 128, 30>}, {pipeline_mode = #tpu.pipeline_mode<synchronous>, transform_indices = @transform_1, window_bounds = array<i64: 30, 128>}, {pipeline_mode = #tpu.pipeline_mode<synchronous>, transform_indices = @transform_2, window_bounds = array<i64: 1, 128>}, {pipeline_mode = #tpu.pipeline_mode<synchronous>, transform_indices = @transform_3, window_bounds = array<i64: 64, 128>}, {pipeline_mode = #tpu.pipeline_mode<synchronous>, transform_indices = @transform_4, window_bounds = array<i64: 64, 1>}, {pipeline_mode = #tpu.pipeline_mode<synchronous>, transform_indices = @transform_5, window_bounds = array<i64: 1, 64>}, {pipeline_mode = #tpu.pipeline_mode<synchronous>, transform_indices = @transform_6, window_bounds = array<i64: 1, 1>}, {transform_indices = @transform_7, window_bounds = array<i64: 1, 128>}]} {
    %c0 = arith.constant 0 : index
    %c0_0 = arith.constant 0 : index
    %0 = vector.load %arg1[%c0, %c0_0] : memref<128x30xf32, #tpu.memory_space<vmem>>, vector<128x30xf32>
    %c0_1 = arith.constant 0 : index
    %c0_2 = arith.constant 0 : index
    %1 = vector.load %arg2[%c0_1, %c0_2] : memref<30x128xf32, #tpu.memory_space<vmem>>, vector<30x128xf32>
    %cst = arith.constant dense<0.000000e+00> : vector<128x128xf32>
    %2 = tpu.matmul %0, %1, %cst {dimension_numbers = #tpu.dot_dimension_numbers<[1], [0], [0], [1], [0, 0, 1, 1], [], []>} : vector<128x30xf32>, vector<30x128xf32>, vector<128x128xf32> -> vector<128x128xf32>
    %c0_3 = arith.constant 0 : index
    %c0_4 = arith.constant 0 : index
    %3 = vector.load %arg3[%c0_3, %c0_4] : memref<1x128xf32, #tpu.memory_space<vmem>>, vector<1x128xf32>
    %4 = vector.broadcast %3 : vector<1x128xf32> to vector<128x128xf32>
    %5 = arith.addf %2, %4 : vector<128x128xf32>
    %cst_5 = arith.constant 0.000000e+00 : f32
    %6 = vector.broadcast %cst_5 : f32 to vector<128x128xf32>
    %7 = arith.maximumf %5, %6 : vector<128x128xf32>
    %8 = tpu.transpose %7, [1, 0] : vector<128x128xf32> -> vector<128x128xf32>
    %c0_6 = arith.constant 0 : index
    %c0_7 = arith.constant 0 : index
    %9 = vector.load %arg4[%c0_6, %c0_7] : memref<64x128xf32, #tpu.memory_space<vmem>>, vector<64x128xf32>
    %cst_8 = arith.constant dense<0.000000e+00> : vector<64x128xf32>
    %10 = tpu.matmul %9, %8, %cst_8 {dimension_numbers = #tpu.dot_dimension_numbers<[1], [0], [0], [1], [0, 0, 1, 1], [], []>} : vector<64x128xf32>, vector<128x128xf32>, vector<64x128xf32> -> vector<64x128xf32>
    %c0_9 = arith.constant 0 : index
    %c0_10 = arith.constant 0 : index
    %11 = vector.load %arg5[%c0_9, %c0_10] : memref<64x1xf32, #tpu.memory_space<vmem>>, vector<64x1xf32>
    %12 = vector.broadcast %11 : vector<64x1xf32> to vector<64x128xf32>
    %13 = arith.addf %10, %12 : vector<64x128xf32>
    %cst_11 = arith.constant 0.000000e+00 : f32
    %14 = vector.broadcast %cst_11 : f32 to vector<64x128xf32>
    %15 = arith.maximumf %13, %14 : vector<64x128xf32>
    %c0_12 = arith.constant 0 : index
    %c0_13 = arith.constant 0 : index
    %16 = vector.load %arg6[%c0_12, %c0_13] : memref<1x64xf32, #tpu.memory_space<vmem>>, vector<1x64xf32>
    %cst_14 = arith.constant dense<0.000000e+00> : vector<1x128xf32>
    %17 = tpu.matmul %16, %15, %cst_14 {dimension_numbers = #tpu.dot_dimension_numbers<[1], [0], [0], [1], [0, 0, 1, 1], [], []>} : vector<1x64xf32>, vector<64x128xf32>, vector<1x128xf32> -> vector<1x128xf32>
    %c0_15 = arith.constant 0 : index
    %c0_16 = arith.constant 0 : index
    %18 = vector.load %arg7[%c0_15, %c0_16] : memref<1x1xf32, #tpu.memory_space<vmem>>, vector<1x1xf32>
    %19 = vector.broadcast %18 : vector<1x1xf32> to vector<1x128xf32>
    %20 = arith.addf %17, %19 : vector<1x128xf32>
    %cst_17 = arith.constant 0.000000e+00 : f32
    %21 = vector.broadcast %cst_17 : f32 to vector<1x128xf32>
    %22 = arith.subf %21, %20 : vector<1x128xf32>
    %23 = math.exp %22 : vector<1x128xf32>
    %cst_18 = arith.constant 1.000000e+00 : f32
    %24 = vector.broadcast %cst_18 : f32 to vector<1x128xf32>
    %25 = arith.addf %24, %23 : vector<1x128xf32>
    %cst_19 = arith.constant 1.000000e+00 : f32
    %26 = vector.broadcast %cst_19 : f32 to vector<1x128xf32>
    %27 = arith.divf %26, %25 : vector<1x128xf32>
    %c0_20 = arith.constant 0 : index
    %c0_21 = arith.constant 0 : index
    %28 = vector.load %arg8[%c0_20, %c0_21] : memref<1x128xf32, #tpu.memory_space<vmem>>, vector<1x128xf32>
    tpu.vector_store %arg8[%c0_20, %c0_21], %27 {strides = array<i32>} : memref<1x128xf32, #tpu.memory_space<vmem>>, vector<1x128xf32>,
    return
  }
  func.func @transform_0(%arg0: i32) -> (i32, i32) {
    %c0_i32 = arith.constant 0 : i32
    %c0_i32_0 = arith.constant 0 : i32
    return %arg0, %c0_i32 : i32, i32
  }
  func.func @transform_1(%arg0: i32) -> (i32, i32) {
    %c0_i32 = arith.constant 0 : i32
    %c0_i32_0 = arith.constant 0 : i32
    %c0_i32_1 = arith.constant 0 : i32
    return %c0_i32, %c0_i32_0 : i32, i32
  }
  func.func @transform_2(%arg0: i32) -> (i32, i32) {
    %c0_i32 = arith.constant 0 : i32
    %c0_i32_0 = arith.constant 0 : i32
    %c0_i32_1 = arith.constant 0 : i32
    return %c0_i32, %c0_i32_0 : i32, i32
  }
  func.func @transform_3(%arg0: i32) -> (i32, i32) {
    %c0_i32 = arith.constant 0 : i32
    %c0_i32_0 = arith.constant 0 : i32
    %c0_i32_1 = arith.constant 0 : i32
    return %c0_i32, %c0_i32_0 : i32, i32
  }
  func.func @transform_4(%arg0: i32) -> (i32, i32) {
    %c0_i32 = arith.constant 0 : i32
    %c0_i32_0 = arith.constant 0 : i32
    %c0_i32_1 = arith.constant 0 : i32
    return %c0_i32, %c0_i32_0 : i32, i32
  }
  func.func @transform_5(%arg0: i32) -> (i32, i32) {
    %c0_i32 = arith.constant 0 : i32
    %c0_i32_0 = arith.constant 0 : i32
    %c0_i32_1 = arith.constant 0 : i32
    return %c0_i32, %c0_i32_0 : i32, i32
  }
  func.func @transform_6(%arg0: i32) -> (i32, i32) {
    %c0_i32 = arith.constant 0 : i32
    %c0_i32_0 = arith.constant 0 : i32
    %c0_i32_1 = arith.constant 0 : i32
    return %c0_i32, %c0_i32_0 : i32, i32
  }
  func.func @transform_7(%arg0: i32) -> (i32, i32) {
    %c0_i32 = arith.constant 0 : i32
    %c0_i32_0 = arith.constant 0 : i32
    return %c0_i32, %arg0 : i32, i32
  }
}

</mosaic_0001>

<bundles_post_ra>
// kernel: tpu_custom_call.1
= control target key start
LH: loop header
LB: loop body
LE: loop exit
PB: predicated region body
PF: predicated region fallthrough
CT: control target
= control target key end

     0   :  { %s933_s0 = inlined_call_operand.vmem [shape: f32[128,30], index: 0, kind: input, shape index: {}]   ;;  %s934_s1 = inlined_call_operand.vmem [shape: f32[30,128], index: 1, kind: input, shape index: {}]   ;;  %s935_s2 = inlined_call_operand.vmem [shape: f32[1,128], index: 2, kind: input, shape index: {}]   ;;  %s936_s3 = inlined_call_operand.vmem [shape: f32[64,128], index: 3, kind: input, shape index: {}]   ;;  %s937_s4 = inlined_call_operand.vmem [shape: f32[64,1], index: 4, kind: input, shape index: {}]   ;;  %s938_s5 = inlined_call_operand.vmem [shape: f32[1,64], index: 5, kind: input, shape index: {}]   ;;  %s939_s6 = inlined_call_operand.<no memory space> [shape: f32[1,1], index: 6, kind: input, shape index: {}]   ;;  %s940_s7 = inlined_call_operand.hbm [shape: f32[1,128], index: 7, kind: output, shape index: {}]  }
   0x1   :  { %v12_v0 = vstv %s939_s6 }
   0x2   :  { %13 = vst [vmem:[#allocation2] sm:$0x1] %v12_v0 }
   0x3   :  { %v48_v1 = vld [vmem:[%s934_s1 + $0x18] sm:$0x3f]  ;;  %vm105_vm0 = vcmask 1045504   ;;  %v47_v2 = vld [vmem:[%s934_s1 + $0x10] sm:$0xff]  ;;  %vm56_vm1 = vcmask 244736   ;;  %v29_v3 = vld [vmem:[%s933_s0] sm:$0xff] }
   0x4   :  { %617 = vmatprep.subr.msk.mxu0 %vm105_vm0, %v48_v1  ;;  %v46_v4 = vld [vmem:[%s934_s1 + $0x8] sm:$0xff]  ;;  %625 = vmatprep.mubr.msk.f32.mxu0 %vm56_vm1, %v29_v3  ;;  %v45_v5 = vld [vmem:[%s934_s1] sm:$0xff] }
   0x5   :  { %618 = vmatpush3.msk.msra.mxu0 %vm105_vm0, %v48_v1  ;;  %v30_v6 = vld [vmem:[%s933_s0 + $0x8] sm:$0xff] }
   0x6   :  { %619 = vmatprep.subr.mxu0 %v47_v2 }
   0x7   :  { %620 = vmatpush3.msra.mxu0 %v47_v2 }
   0x8   :  { %621 = vmatprep.subr.mxu0 %v46_v4 }
   0x9   :  { %622 = vmatpush3.msra.mxu0 %v46_v4 }
   0xa   :  { %14 = vsyncpa [#allocation4], 0  ;;  %623 = vmatprep.subr.mxu0 %v45_v5  ;;  %v31_v7 = vld [vmem:[%s933_s0 + $0x10] sm:$0xff]  ;;  %v32_v8 = vld [vmem:[%s933_s0 + $0x18] sm:$0xff]  ;;  %v744_v24 = vmov 0   ;;  %vm746_vm2 = vmmov 0  }
   0xb   :  { %624 = vmatpush3.msra.mxu0 %v45_v5  ;;  %v33_v9 = vld [vmem:[%s933_s0 + $0x20] sm:$0xff]  ;;  %v34_v10 = vld [vmem:[%s933_s0 + $0x28] sm:$0xff]  ;;  %v35_v11 = vld [vmem:[%s933_s0 + $0x30] sm:$0xff]  ;;  %716 = vset.pattern.permute.xlu0 %v744_v24  ;;  %vm450_vm3 = vcmask 523264   ;;  %s747_s22 = smov [#allocation3]  }
   0xc   :  { %626 = vmatmul.mubr.msk.f32.vlgmr.msra.gmra.mxu0 %vm56_vm1, %v30_v6  ;;  %v36_v12 = vld [vmem:[%s933_s0 + $0x38] sm:$0xff]  ;;  %v37_v13 = vld [vmem:[%s933_s0 + $0x40] sm:$0xff]  ;;  %v38_v14 = vld [vmem:[%s933_s0 + $0x48] sm:$0xff]  ;;  %717 = vset.pattern.permute.xlu1 %v744_v24  ;;  %v745_v24 = vmov 0.0  }
   0xd   :  { %628 = vmatprep.mubr.msk.f32.mxu0 %vm56_vm1, %v31_v7  ;;  %v39_v15 = vld [vmem:[%s933_s0 + $0x50] sm:$0xff]  ;;  %v40_v16 = vld [vmem:[%s933_s0 + $0x58] sm:$0xff]  ;;  %v41_v17 = vld [vmem:[%s933_s0 + $0x60] sm:$0xff]  ;;  %693 = vmatprep.subr.mxu0 %v745_v24 }
   0xe   :  { %v42_v18 = vld [vmem:[%s933_s0 + $0x68] sm:$0xff]  ;;  %v43_v19 = vld [vmem:[%s933_s0 + $0x70] sm:$0xff]  ;;  %v44_v20 = vld [vmem:[%s933_s0 + $0x78] sm:$0xff] }
   0xf   :  { %v270_v21 = vld [vmem:[%s936_s3] sm:$0xff]  ;;  %v285_v22 = vld [vmem:[%s937_s4 + $0x38] sm:$0xff]  ;;  %v283_v23 = vld [vmem:[%s937_s4 + $0x28] sm:$0xff] }
  0x10   :  { %629 = vmatmul.mubr.msk.f32.gmra.mxu0 %vm56_vm1, %v32_v8  ;;  %681 = vmatprep.mubr.f32.mxu1 %v270_v21  ;;  %v284_v25 = vld [vmem:[%s937_s4 + $0x30] sm:$0xff]  ;;  %v282_v26 = vld [vmem:[%s937_s4 + $0x20] sm:$0xff]  ;;  %v281_v27 = vld [vmem:[%s937_s4 + $0x18] sm:$0xff] }
  0x11   :  { %631 = vmatprep.mubr.msk.f32.mxu0 %vm56_vm1, %v33_v9  ;;  %323 = vperm.xlu0 %716, %v285_v22   ;;  %v280_v28 = vld [vmem:[%s937_s4 + $0x10] sm:$0xff]  ;;  %v279_v29 = vld [vmem:[%s937_s4 + $0x8] sm:$0xff]  ;;  %v278_v30 = vld [vmem:[%s937_s4] sm:$0xff] }
  0x12   :  { %313 = vperm.xlu1 %717, %v283_v23   ;;  %v440_v31 = vld [vmem:[#allocation2] sm:$0x1]  ;;  %v275_v21 = vld [vmem:[%s936_s3 + $0x28] sm:$0xff]  ;;  %v276_v22 = vld [vmem:[%s936_s3 + $0x30] sm:$0xff] }
  0x13   :  { %v545_v46 = vld [vmem:[%s935_s2] ss:$0 sm:$0xff]  ;;  %v277_v23 = vld [vmem:[%s936_s3 + $0x38] sm:$0xff] }
  0x14   :  { %632 = vmatmul.mubr.msk.f32.gmra.mxu0 %vm56_vm1, %v34_v10 }
  0x15   :  { %634 = vmatprep.mubr.msk.f32.mxu0 %vm56_vm1, %v35_v11  ;;  %318 = vperm.xlu0 %716, %v284_v25  }
  0x16   :  { %308 = vperm.xlu1 %717, %v282_v26  }
  0x18   :  { %635 = vmatmul.mubr.msk.f32.gmra.mxu0 %vm56_vm1, %v36_v12 }
  0x19   :  { %637 = vmatprep.mubr.msk.f32.mxu0 %vm56_vm1, %v37_v13  ;;  %303 = vperm.xlu0 %716, %v281_v27  }
  0x1a   :  { %298 = vperm.xlu1 %717, %v280_v28  }
  0x1c   :  { %638 = vmatmul.mubr.msk.f32.gmra.mxu0 %vm56_vm1, %v38_v14 }
  0x1d   :  { %640 = vmatprep.mubr.msk.f32.mxu0 %vm56_vm1, %v39_v15  ;;  %293 = vperm.xlu0 %716, %v279_v29  }
  0x1e   :  { %288 = vperm.xlu1 %717, %v278_v30  }
  0x20   :  { %641 = vmatmul.mubr.msk.f32.gmra.mxu0 %vm56_vm1, %v40_v16 }
  0x21   :  { %643 = vmatprep.mubr.msk.f32.mxu0 %vm56_vm1, %v41_v17  ;;  %443 = vperm.xlu0 %716, %v440_v31   ;;  %v271_v17 = vld [vmem:[%s936_s3 + $0x8] sm:$0xff] }
  0x24   :  { %644 = vmatmul.mubr.msk.f32.gmra.mxu0 %vm56_vm1, %v42_v18  ;;  %v272_v18 = vld [vmem:[%s936_s3 + $0x10] sm:$0xff] }
  0x25   :  { %646 = vmatprep.mubr.msk.f32.mxu0 %vm56_vm1, %v43_v19  ;;  %v273_v19 = vld [vmem:[%s936_s3 + $0x18] sm:$0xff] }
  0x28   :  { %647 = vmatmul.mubr.msk.f32.gmra.mxu0 %vm56_vm1, %v44_v20  ;;  %v274_v20 = vld [vmem:[%s936_s3 + $0x20] sm:$0xff] }
  0x29   :  { %709 = vmatprep.mubr.msk.f32.mxu0 %vm746_vm2, %v745_v24 }
  0x8c   :  { %v324_v26 = vpop.permute.xlu0 %323 }
  0x8d   :  { %v314_v28 = vpop.permute.xlu1 %313 }
  0x90   :  { %v319_v31 = vpop.permute.xlu0 %318 }
  0xcc   :  { %v894_v32 = vpop.f32.mrf.mxu0 }
  0xcd   :  { %v181_v12 = vadd.f32 %v894_v32, %v545_v46 }
  0xce   :  { %v896_v33 = vpop.f32.mrf.mxu0 }
  0xcf   :  { %v255_v14 = vmax.f32 %v181_v12, 0.0  ;;  %v176_v15 = vadd.f32 %v545_v46, %v896_v33  ;;  %v309_v33 = vpop.permute.xlu1 %308 }
  0xd0   :  { %v630_v34 = vpop.f32.mrf.mxu0 }
  0xd1   :  { %v191_v8 = vadd.f32 %v630_v34, %v545_v46  ;;  %v254_v16 = vmax.f32 %v176_v15, 0.0 }
  0xd2   :  { %v898_v35 = vpop.f32.mrf.mxu0 }
  0xd3   :  { %v257_v10 = vmax.f32 %v191_v8, 0.0  ;;  %v186_v11 = vadd.f32 %v545_v46, %v898_v35 }
  0xd4   :  { %v633_v36 = vpop.f32.mrf.mxu0 }
  0xd5   :  { %v201_v4 = vadd.f32 %v633_v36, %v545_v46  ;;  %v256_v13 = vmax.f32 %v186_v11, 0.0 }
  0xd6   :  { %v195_v37 = vpop.f32.mrf.mxu0 }
  0xd7   :  { %v259_v6 = vmax.f32 %v201_v4, 0.0  ;;  %v196_v7 = vadd.f32 %v545_v46, %v195_v37  ;;  %v304_v37 = vpop.permute.xlu0 %303 }
  0xd8   :  { %v636_v38 = vpop.f32.mrf.mxu0 }
  0xd9   :  { %v211_v0 = vadd.f32 %v636_v38, %v545_v46  ;;  %v258_v9 = vmax.f32 %v196_v7, 0.0 }
  0xda   :  { %v205_v39 = vpop.f32.mrf.mxu0 }
  0xdb   :  { %v261_v2 = vmax.f32 %v211_v0, 0.0  ;;  %v206_v3 = vadd.f32 %v545_v46, %v205_v39 }
  0xdc   :  { %v639_v40 = vpop.f32.mrf.mxu0 }
  0xdd   :  { %v221_v60 = vadd.f32 %v639_v40, %v545_v46  ;;  %v260_v5 = vmax.f32 %v206_v3, 0.0 }
  0xde   :  { %v215_v41 = vpop.f32.mrf.mxu0 }
  0xdf   :  { %v263_v62 = vmax.f32 %v221_v60, 0.0  ;;  %v216_v63 = vadd.f32 %v545_v46, %v215_v41 }
  0xe0   :  { %v642_v42 = vpop.f32.mrf.mxu0 }
  0xe1   :  { %v231_v56 = vadd.f32 %v642_v42, %v545_v46  ;;  %v262_v1 = vmax.f32 %v216_v63, 0.0  ;;  %v299_v42 = vpop.permute.xlu1 %298 }
  0xe2   :  { %v225_v43 = vpop.f32.mrf.mxu0 }
  0xe3   :  { %v265_v58 = vmax.f32 %v231_v56, 0.0  ;;  %v226_v59 = vadd.f32 %v545_v46, %v225_v43 }
  0xe4   :  { %v645_v44 = vpop.f32.mrf.mxu0 }
  0xe5   :  { %v241_v52 = vadd.f32 %v645_v44, %v545_v46  ;;  %v264_v61 = vmax.f32 %v226_v59, 0.0 }
  0xe6   :  { %v235_v45 = vpop.f32.mrf.mxu0 }
  0xe7   :  { %v267_v54 = vmax.f32 %v241_v52, 0.0  ;;  %v236_v55 = vadd.f32 %v545_v46, %v235_v45 }
  0xe8   :  { %v648_v47 = vpop.f32.mrf.mxu0 }
  0xe9   :  { %v251_v48 = vadd.f32 %v648_v47, %v545_v46  ;;  %v266_v57 = vmax.f32 %v236_v55, 0.0  ;;  %v294_v47 = vpop.permute.xlu0 %293 }
  0xea   :  { %v245_v49 = vpop.f32.mrf.mxu0 }
  0xeb   :  { %v269_v50 = vmax.f32 %v251_v48, 0.0  ;;  %v246_v51 = vadd.f32 %v545_v46, %v245_v49 }
  0xed   :  { %v268_v53 = vmax.f32 %v246_v51, 0.0  ;;  %649 = vmatprep.subr.mxu1 %v269_v50 }
  0xee   :  { %650 = vmatpush3.xpose.msra.mxu1 %v269_v50  ;;  %v289_v50 = vpop.permute.xlu1 %288 }
  0xef   :  { %651 = vmatprep.subr.mxu1 %v268_v53 }
  0xf2   :  { %652 = vmatpush3.xpose.msra.mxu1 %v268_v53 }
  0xf3   :  { %653 = vmatprep.subr.mxu1 %v267_v54 }
  0xf6   :  { %654 = vmatpush3.xpose.msra.mxu1 %v267_v54 }
  0xf7   :  { %655 = vmatprep.subr.mxu1 %v266_v57 }
  0xfa   :  { %656 = vmatpush3.xpose.msra.mxu1 %v266_v57  ;;  %v439_v57 = vld [vmem:[%s938_s5] sm:$0x1]  ;;  %s537_s5 = sshll.u32 %s747_s22, 4  ;;  %s538_s5 = int_to_ptr.vmem [resolvable:$true] %s537_s5 }
  0xfb   :  { %657 = vmatprep.subr.mxu1 %v265_v58  ;;  %s722_s23 = scalar_lea.vmem %s538_s5, 16  ;;  %s726_s24 = scalar_lea.vmem %s538_s5, 32 }
  0xfc   :  { %p723_p0 = scmp.ne.s32.totalorder %s538_s5, %s722_s23  ;;  %p727_p1 = scmp.lt.s32.totalorder %s538_s5, %s538_s5 }
  0xfd   :  { %p728_p2 = scmp.lt.s32.totalorder %s726_s24, %s722_s23 }
  0xfe   :  { %658 = vmatpush3.xpose.msra.mxu1 %v265_v58  ;;  %v446_v58 = vlaneseq }
  0xff   :  { %659 = vmatprep.subr.mxu1 %v264_v61  ;;  %p729_p3 = por %p728_p2, %p727_p1 }
 0x100   :  { %v447_v59 = vshrl.u32 %v446_v58, 7 }
 0x101   :  { %p730_p4 = pnand %p729_p3, %p723_p0 }
 0x102   :  { %660 = vmatpush3.xpose.msra.mxu1 %v264_v61  ;;  %v448_v60 = vsub.s32 0, %v447_v59  ;;  %v444_v61 = vpop.permute.xlu0 %443 }
 0x103   :  { %661 = vmatprep.subr.mxu1 %v263_v62 }
 0x106   :  { %662 = vmatpush3.xpose.msra.mxu1 %v263_v62  ;;  %v449_v62 = vrot.slane %v444_v61, %v448_v60 }
 0x107   :  { %663 = vmatprep.subr.mxu1 %v262_v1 }
 0x10a   :  { %664 = vmatpush3.xpose.msra.mxu1 %v262_v1 }
 0x10b   :  { %665 = vmatprep.subr.mxu1 %v261_v2 }
 0x10e   :  { %666 = vmatpush3.xpose.msra.mxu1 %v261_v2 }
 0x10f   :  { %667 = vmatprep.subr.mxu1 %v260_v5 }
 0x112   :  { %668 = vmatpush3.xpose.msra.mxu1 %v260_v5 }
 0x113   :  { %669 = vmatprep.subr.mxu1 %v259_v6 }
 0x116   :  { %670 = vmatpush3.xpose.msra.mxu1 %v259_v6 }
 0x117   :  { %671 = vmatprep.subr.mxu1 %v258_v9 }
 0x11a   :  { %672 = vmatpush3.xpose.msra.mxu1 %v258_v9 }
 0x11b   :  { %673 = vmatprep.subr.mxu1 %v257_v10 }
 0x11e   :  { %674 = vmatpush3.xpose.msra.mxu1 %v257_v10 }
 0x11f   :  { %675 = vmatprep.subr.mxu1 %v256_v13 }
 0x122   :  { %676 = vmatpush3.xpose.msra.mxu1 %v256_v13 }
 0x123   :  { %677 = vmatprep.subr.mxu1 %v255_v14 }
 0x126   :  { %678 = vmatpush3.xpose.msra.mxu1 %v255_v14 }
 0x127   :  { %679 = vmatprep.subr.mxu1 %v254_v16 }
 0x12a   :  { %680 = vmatpush3.xpose.msra.mxu1 %v254_v16 }
 0x12d   :  { %682 = vmatmul.mubr.f32.vlgmr.msra.gmra.mxu1 %v271_v17 }
 0x12e   :  { %684 = vmatprep.mubr.f32.mxu1 %v272_v18 }
 0x131   :  { %685 = vmatmul.mubr.f32.gmra.mxu1 %v273_v19 }
 0x132   :  { %687 = vmatprep.mubr.f32.mxu1 %v274_v20 }
 0x135   :  { %688 = vmatmul.mubr.f32.gmra.mxu1 %v275_v21 }
 0x136   :  { %690 = vmatprep.mubr.f32.mxu1 %v276_v22 }
 0x139   :  { %691 = vmatmul.mubr.f32.gmra.mxu1 %v277_v23 }
 0x1ed   :  { %v683_v25 = vpop.f32.mrf.mxu1 }
 0x1ee   :  { %v398_v51 = vadd.f32 %v683_v25, %v294_v47 }
 0x1ef   :  { %v392_v27 = vpop.f32.mrf.mxu1 }
 0x1f0   :  { %v393_v53 = vadd.f32 %v392_v27, %v289_v50  ;;  %v432_v55 = vmax.f32 %v398_v51, 0.0 }
 0x1f1   :  { %v686_v29 = vpop.f32.mrf.mxu1 }
 0x1f2   :  { %v408_v45 = vadd.f32 %v686_v29, %v304_v37  ;;  %v431_v56 = vmax.f32 %v393_v53, 0.0 }
 0x1f3   :  { %v402_v30 = vpop.f32.mrf.mxu1 }
 0x1f4   :  { %v403_v48 = vadd.f32 %v402_v30, %v299_v42  ;;  %v434_v52 = vmax.f32 %v408_v45, 0.0 }
 0x1f5   :  { %v689_v32 = vpop.f32.mrf.mxu1 }
 0x1f6   :  { %v418_v39 = vadd.f32 %v689_v32, %v314_v28  ;;  %v433_v54 = vmax.f32 %v403_v48, 0.0 }
 0x1f7   :  { %v412_v34 = vpop.f32.mrf.mxu1 }
 0x1f8   :  { %v413_v43 = vadd.f32 %v412_v34, %v309_v33  ;;  %v436_v46 = vmax.f32 %v418_v39, 0.0 }
 0x1f9   :  { %v692_v35 = vpop.f32.mrf.mxu1 }
 0x1fa   :  { %v428_v36 = vadd.f32 %v692_v35, %v324_v26  ;;  %v435_v49 = vmax.f32 %v413_v43, 0.0 }
 0x1fb   :  { %v422_v38 = vpop.f32.mrf.mxu1 }
 0x1fc   :  { %v438_v40 = vmax.f32 %v428_v36, 0.0  ;;  %v423_v41 = vadd.f32 %v422_v38, %v319_v31 }
 0x1fe   :  { %v437_v44 = vmax.f32 %v423_v41, 0.0  ;;  %694 = vmatpush3.msra.mxu0 %v438_v40 }
 0x1ff   :  { %695 = vmatprep.subr.mxu0 %v745_v24 }
 0x200   :  { %696 = vmatpush3.msra.mxu0 %v437_v44 }
 0x201   :  { %697 = vmatprep.subr.mxu0 %v745_v24 }
 0x202   :  { %698 = vmatpush3.msra.mxu0 %v436_v46 }
 0x203   :  { %699 = vmatprep.subr.mxu0 %v745_v24 }
 0x204   :  { %700 = vmatpush3.msra.mxu0 %v435_v49 }
 0x205   :  { %701 = vmatprep.subr.mxu0 %v745_v24 }
 0x206   :  { %702 = vmatpush3.msra.mxu0 %v434_v52 }
 0x207   :  { %703 = vmatprep.subr.mxu0 %v745_v24 }
 0x208   :  { %704 = vmatpush3.msra.mxu0 %v433_v54 }
 0x209   :  { %705 = vmatprep.subr.mxu0 %v745_v24 }
 0x20a   :  { %706 = vmatpush3.msra.mxu0 %v432_v55 }
 0x20b   :  { %707 = vmatprep.subr.mxu0 %v745_v24 }
 0x20c   :  { %708 = vmatpush3.msra.mxu0 %v431_v56 }
 0x20d   :  { %710 = vmatmul.mubr.msk.f32.vlgmr.msra.gmra.mxu0 %vm450_vm3, %v439_v57 }
 0x2cd   :  { %v520_v63 = vpop.f32.mrf.mxu0 }
 0x2ce   :  { %v521_v0 = vadd.f32 %v520_v63, %v449_v62 }
 0x2cf   :  { %v711_v1 = vpop.f32.mrf.mxu0 }
 0x2d0   :  { %v524_v2 = vsub.f32 0.0, %v521_v0 }
 0x2d2   :  { %v525_v3 = vmul.f32 1.442695, %v524_v2 }
 0x2d4   :  { %718 = vpow2.f32 %v525_v3 }
 0x2e1   :  { %v719_v4 = vpop.eup %718 }
 0x2e2   :  { %v527_v5 = vadd.f32 1.0, %v719_v4 }
 0x2e4   :  { %720 = vrcp.f32 %v527_v5 }
 0x2f1   :  { %v721_v6 = vpop.eup %720 }
 0x2f2   :  { %530 = vst [vmem:[#allocation3] sm:$0x1] %v721_v6 }
 0x2f3   :  { %733 = shalt.err (!%p730_p4)
}
 0x2f4   :  { %540 = dma.vmem_to_hbm [thread:$0]  %s538_s5, 16, %s940_s7, [#allocation4]  }
 0x2f5   :  { %742 = dma.done.wait [#allocation4], 16  }
 0x2f6   :  { %743 = vsyncadd [#allocation4], 4294967280 }
 0x2f7   :  { %544 = vsyncpa [#allocation4], 1 }

</bundles_post_ra>
